<compile_context>
chip_gen: v7x
topology: tpu7x:2x2x1
jax: 0.10.0
libtpu: 0.0.40
codegen_flags: <defaults>
</compile_context>

<pallas_src>
import functools

import jax
import jax.numpy as jnp
from jax.experimental import pallas as pl
from jax.experimental.pallas import tpu as pltpu

_LANE = 128
_SUBLANE = 8


def _round_up(x: int, m: int) -> int:
    return ((x + m - 1) // m) * m


def _slab_kernel(seed_ref, out_ref, *, n_nodes, n_edges, edge_dim):
    """Fill one lane-dense slab with Bernoulli(1/2) samples + empty-edge-row fix.

    Slab layout (row-major, lane-dense):
      rows [0, n_nodes)                 -> node rows (features in lanes [0, node_dim))
      rows [n_nodes, n_nodes + n_edges) -> edge rows (features in lanes [0, edge_dim))
      remaining rows / lanes            -> padding (sliced off in the wrapper)
    """
    shape = out_ref.shape
    seed = seed_ref[0].astype(jnp.uint32)

    # Index iotas computed exactly once (no broadcast_in_dim re-emission).
    row = jax.lax.broadcasted_iota(jnp.int32, shape, 0)
    lane = jax.lax.broadcasted_iota(jnp.int32, shape, 1)

    # Counter-based PRNG: murmur3 fmix32 of (flat element index, seed).
    # Integer-only VPU ops; uint32 wraparound is intended.
    x = (row * jnp.int32(shape[1]) + lane).astype(jnp.uint32)
    x = x * jnp.uint32(0x9E3779B9) + seed * jnp.uint32(0x85EBCA6B) + jnp.uint32(1)
    x = x ^ (x >> jnp.uint32(16))
    x = x * jnp.uint32(0x7FEB352D)
    x = x ^ (x >> jnp.uint32(15))
    x = x * jnp.uint32(0x846CA68B)
    x = x ^ (x >> jnp.uint32(16))

    # torch.bernoulli(torch.rand_like(.)) has marginal exactly Bernoulli(1/2),
    # so one fair hash bit per element reproduces the distribution.
    coin = (x >> jnp.uint32(31)).astype(jnp.int32)  # {0, 1}

    # Empty-edge-row fix: any edge row whose real features (lanes < edge_dim)
    # are all zero gets feature 0 forced to 1.
    is_edge_row = (row >= n_nodes) & (row < n_nodes + n_edges)
    edge_live = jnp.where(is_edge_row & (lane < edge_dim), coin, 0)
    row_any = jnp.max(edge_live, axis=-1, keepdims=True)  # XLU cross-lane reduce
    fix = is_edge_row & (row_any == 0) & (lane == 0)

    # Single cast at the single, fully lane-dense store (unmasked vst).
    out_ref[...] = jnp.where(fix, jnp.int32(1), coin).astype(out_ref.dtype)


@functools.lru_cache(maxsize=None)
def _build_random_graph_fn(nodes_shape, nodes_dtype_name, edges_shape, edges_dtype_name):
    """Builds a jitted (seed int32 scalar) -> (nodes, edges) sampler for fixed shapes."""
    n_nodes, node_dim = nodes_shape
    n_edges, edge_dim = edges_shape
    nodes_dtype = jnp.dtype(nodes_dtype_name)
    edges_dtype = jnp.dtype(edges_dtype_name)

    # TODO(synk): tile over rows/lanes (and add a "parallel" batch grid axis for
    # v7x's two TensorCores) if this is ever used with large / batched graphs;
    # at DummyModel sizes a single full-array VMEM block is optimal.
    slab_rows = _round_up(max(n_nodes + n_edges, 1), _SUBLANE)
    slab_lanes = _round_up(max(node_dim, edge_dim, 1), _LANE)

    kernel = functools.partial(
        _slab_kernel, n_nodes=n_nodes, n_edges=n_edges, edge_dim=edge_dim)

    slab_call = pl.pallas_call(
        kernel,
        out_shape=jax.ShapeDtypeStruct((slab_rows, slab_lanes), nodes_dtype),
        in_specs=[pl.BlockSpec(memory_space=pltpu.MemorySpace.SMEM)],
        out_specs=pl.BlockSpec(memory_space=pltpu.MemorySpace.VMEM),
    )

    @jax.jit
    def sample(seed):
        seed_arr = jnp.reshape(seed.astype(jnp.int32), (1,))
        slab = slab_call(seed_arr)
        nodes = slab[:n_nodes, :node_dim]
        edges = slab[n_nodes:n_nodes + n_edges, :edge_dim].astype(edges_dtype)
        return nodes, edges

    return sample


class DummyModelPallas:
    """JAX/Pallas port of predicators.gnn.neupi.DummyModel."""

    def __init__(self, random: bool):
        self.random = random
        # place_holder_mlp = nn.Linear(1, 1): present in the reference module
        # but never used by forward(); kept only for parameter parity.
        self.place_holder_w = jnp.full((1, 1), 0.5, dtype=jnp.float32)
        self.place_holder_b = jnp.zeros((1,), dtype=jnp.float32)
        # torch.bernoulli advances torch's global RNG; emulate by advancing an
        # internal counter when no explicit seed is supplied.
        self._call_count = 0

    def forward(self, x, seed=None):
        if not self.random:
            return x
        if seed is None:
            seed = self._call_count
        self._call_count += 1

        sampler = _build_random_graph_fn(
            tuple(x["nodes"].shape), jnp.dtype(x["nodes"].dtype).name,
            tuple(x["edges"].shape), jnp.dtype(x["edges"].dtype).name,
        )
        nodes, edges = sampler(jnp.asarray(seed, dtype=jnp.int32))
        return {
            "n_node": x["n_node"],
            "n_edge": x["n_edge"],
            "nodes": nodes,
            "edges": edges,
            "senders": x["senders"],
            "receivers": x["receivers"],
        }

    __call__ = forward


if __name__ == "__main__":
    key = jax.random.PRNGKey(0)
    k_nodes, k_edges, k_snd, k_rcv = jax.random.split(key, 4)

    n_nodes, node_dim = 8, 16
    n_edges, edge_dim = 12, 8

    graph = {
        "n_node": jnp.asarray([n_nodes], dtype=jnp.int32),
        "n_edge": jnp.asarray([n_edges], dtype=jnp.int32),
        "nodes": jax.random.normal(k_nodes, (n_nodes, node_dim), dtype=jnp.float32),
        "edges": jax.random.normal(k_edges, (n_edges, edge_dim), dtype=jnp.float32),
        "senders": jax.random.randint(k_snd, (n_edges,), 0, n_nodes, dtype=jnp.int32),
        "receivers": jax.random.randint(k_rcv, (n_edges,), 0, n_nodes, dtype=jnp.int32),
    }

    # random=False path: identity.
    ident = DummyModelPallas(random=False)(graph)
    assert ident is graph

    # random=True path: one fused, lane-dense Pallas kernel under jit.
    model = DummyModelPallas(random=True)
    out = model(graph, seed=1234)
    out = jax.tree_util.tree_map(jax.block_until_ready, out)

    nodes, edges = out["nodes"], out["edges"]
    assert nodes.shape == graph["nodes"].shape and nodes.dtype == graph["nodes"].dtype
    assert edges.shape == graph["edges"].shape and edges.dtype == graph["edges"].dtype
    # values are exactly 0 or 1
    assert bool(jnp.all((nodes == 0.0) | (nodes == 1.0)))
    assert bool(jnp.all((edges == 0.0) | (edges == 1.0)))
    # every edge row has at least one nonzero entry (the for-loop fix)
    assert bool(jnp.all(jnp.sum(edges, axis=-1) >= 1.0))
    # metadata passed through unchanged
    assert bool(jnp.all(out["senders"] == graph["senders"]))
    assert bool(jnp.all(out["receivers"] == graph["receivers"]))

    # Calls without an explicit seed advance the internal counter (torch-style
    # RNG-state advance), so consecutive calls differ.
    out2 = model(graph)
    out3 = model(graph)
    jax.block_until_ready(out3["nodes"])
    assert not bool(jnp.all(out2["nodes"] == out3["nodes"]))

    print("KERNEL_OK")
</pallas_src>

<mosaic_0001>
module attributes {stable_mosaic.version = 11 : i64} {
  func.func @_slab_kernel(%arg0: memref<1xi32, #tpu.memory_space<smem>>, %arg1: memref<24x128xf32, #tpu.memory_space<vmem>>) attributes {dimension_semantics = [], scalar_prefetch = 0 : i64, scratch_operands = 0 : i64, tpu.core_type = #tpu.core_type<tc>} {
    %c0 = arith.constant 0 : index
    %0 = memref.load %arg0[%c0] : memref<1xi32, #tpu.memory_space<smem>>
    %1 = tpu.iota {dimensions = array<i32: 0>} : vector<24x128xi32>
    %2 = tpu.iota {dimensions = array<i32: 1>} : vector<24x128xi32>
    %c128_i32 = arith.constant 128 : i32
    %3 = vector.broadcast %c128_i32 : i32 to vector<24x128xi32>
    %4 = arith.muli %1, %3 : vector<24x128xi32>
    %5 = arith.addi %4, %2 : vector<24x128xi32>
    %c-1640531527_i32 = arith.constant -1640531527 : i32
    %6 = vector.broadcast %c-1640531527_i32 : i32 to vector<24x128xi32>
    %7 = arith.muli %5, %6 : vector<24x128xi32>
    %c-2048144789_i32 = arith.constant -2048144789 : i32
    %8 = arith.muli %0, %c-2048144789_i32 : i32
    %9 = vector.broadcast %8 : i32 to vector<24x128xi32>
    %10 = arith.addi %7, %9 : vector<24x128xi32>
    %c1_i32 = arith.constant 1 : i32
    %11 = vector.broadcast %c1_i32 : i32 to vector<24x128xi32>
    %12 = arith.addi %10, %11 : vector<24x128xi32>
    %c16_i32 = arith.constant 16 : i32
    %13 = vector.broadcast %c16_i32 : i32 to vector<24x128xi32>
    %14 = arith.shrui %12, %13 : vector<24x128xi32>
    %15 = arith.xori %12, %14 : vector<24x128xi32>
    %c2146121005_i32 = arith.constant 2146121005 : i32
    %16 = vector.broadcast %c2146121005_i32 : i32 to vector<24x128xi32>
    %17 = arith.muli %15, %16 : vector<24x128xi32>
    %c15_i32 = arith.constant 15 : i32
    %18 = vector.broadcast %c15_i32 : i32 to vector<24x128xi32>
    %19 = arith.shrui %17, %18 : vector<24x128xi32>
    %20 = arith.xori %17, %19 : vector<24x128xi32>
    %c-2073254261_i32 = arith.constant -2073254261 : i32
    %21 = vector.broadcast %c-2073254261_i32 : i32 to vector<24x128xi32>
    %22 = arith.muli %20, %21 : vector<24x128xi32>
    %c16_i32_0 = arith.constant 16 : i32
    %23 = vector.broadcast %c16_i32_0 : i32 to vector<24x128xi32>
    %24 = arith.shrui %22, %23 : vector<24x128xi32>
    %25 = arith.xori %22, %24 : vector<24x128xi32>
    %c31_i32 = arith.constant 31 : i32
    %26 = vector.broadcast %c31_i32 : i32 to vector<24x128xi32>
    %27 = arith.shrui %25, %26 : vector<24x128xi32>
    %c8_i32 = arith.constant 8 : i32
    %28 = vector.broadcast %c8_i32 : i32 to vector<24x128xi32>
    %29 = arith.cmpi sge, %1, %28 : vector<24x128xi32>
    %c20_i32 = arith.constant 20 : i32
    %30 = vector.broadcast %c20_i32 : i32 to vector<24x128xi32>
    %31 = arith.cmpi slt, %1, %30 : vector<24x128xi32>
    %32 = arith.andi %29, %31 : vector<24x128xi1>
    %c8_i32_1 = arith.constant 8 : i32
    %33 = vector.broadcast %c8_i32_1 : i32 to vector<24x128xi32>
    %34 = arith.cmpi slt, %2, %33 : vector<24x128xi32>
    %35 = arith.andi %32, %34 : vector<24x128xi1>
    %c0_i32 = arith.constant 0 : i32
    %36 = vector.broadcast %c0_i32 : i32 to vector<24x128xi32>
    %37 = arith.select %35, %27, %36 : vector<24x128xi1>, vector<24x128xi32>
    %cst = arith.constant dense<-2147483648> : vector<24xi32>
    %38 = vector.multi_reduction <maxsi>, %37, %cst [1] : vector<24x128xi32> to vector<24xi32>
    %39 = vector.shape_cast %38 : vector<24xi32> to vector<24x1xi32>
    %c0_i32_2 = arith.constant 0 : i32
    %40 = vector.broadcast %c0_i32_2 : i32 to vector<24x1xi32>
    %41 = arith.cmpi eq, %39, %40 : vector<24x1xi32>
    %42 = vector.broadcast %41 : vector<24x1xi1> to vector<24x128xi1>
    %43 = arith.andi %32, %42 : vector<24x128xi1>
    %c0_i32_3 = arith.constant 0 : i32
    %44 = vector.broadcast %c0_i32_3 : i32 to vector<24x128xi32>
    %45 = arith.cmpi eq, %2, %44 : vector<24x128xi32>
    %46 = arith.andi %43, %45 : vector<24x128xi1>
    %c1_i32_4 = arith.constant 1 : i32
    %47 = vector.broadcast %c1_i32_4 : i32 to vector<24x128xi32>
    %48 = arith.select %46, %47, %27 : vector<24x128xi1>, vector<24x128xi32>
    %49 = arith.sitofp %48 : vector<24x128xi32> to vector<24x128xf32>
    %c0_5 = arith.constant 0 : index
    %c0_6 = arith.constant 0 : index
    %50 = vector.load %arg1[%c0_5, %c0_6] : memref<24x128xf32, #tpu.memory_space<vmem>>, vector<24x128xf32>
    tpu.vector_store %arg1[%c0_5, %c0_6], %49 {strides = array<i32>} : memref<24x128xf32, #tpu.memory_space<vmem>>, vector<24x128xf32>,
    return
  }
}

</mosaic_0001>

<bundles_post_ra>
// kernel: sample.1
= control target key start
LH: loop header
LB: loop body
LE: loop exit
PB: predicated region body
PF: predicated region fallthrough
CT: control target
= control target key end

     0   :  { %v10_v0 = vlaneseq  ;;  %s185_s0 = inlined_call_operand.<no memory space> [shape: s32[1], index: 0, kind: input, shape index: {}]   ;;  %s186_s1 = inlined_call_operand.vmem [shape: f32[24,128], index: 1, kind: output, shape index: {}]  }
   0x1   :  { %s25_s8 = smul.u32 2246822507, %s185_s0 }
   0x2   :  { %v11_v1 = vshrl.u32 %v10_v0, 7  ;;  %v160_v4 = vand.u32 127, %v10_v0 }
   0x3   :  { %v26_v12 = vstv %s25_s8 }
   0x4   :  { %v12_v2 = vadd.s32 8, %v11_v1  ;;  %v158_v3 = vadd.s32 16, %v11_v1  ;;  %v16_v5 = vmul.u32 128, %v11_v1  ;;  %vm69_vm1 = vcmp.lt.s32.totalorder %v160_v4, 8 }
   0x5   :  { %vm130_vm5 = vcmp.eq.s32.totalorder %v160_v4, 0 }
   0x6   :  { %v17_v6 = vmul.u32 128, %v12_v2  ;;  %v18_v7 = vmul.u32 128, %v158_v3  ;;  %v19_v8 = vadd.s32 %v16_v5, %v160_v4  ;;  %vm65_vm0 = vcmp.lt.s32.totalorder %v158_v3, 20 }
   0x7   :  { %vm72_vm2 = vmand %vm65_vm0, %vm69_vm1 }
   0x8   :  { %v21_v9 = vadd.s32 %v18_v7, %v160_v4  ;;  %v22_v10 = vmul.u32 2654435769, %v19_v8  ;;  %v20_v11 = vadd.s32 %v17_v6, %v160_v4 }
   0xa   :  { %v24_v13 = vmul.u32 2654435769, %v21_v9  ;;  %v27_v14 = vadd.s32 %v26_v12, %v22_v10  ;;  %v23_v15 = vmul.u32 2654435769, %v20_v11 }
   0xc   :  { %v29_v16 = vadd.s32 %v26_v12, %v24_v13  ;;  %v28_v17 = vadd.s32 %v26_v12, %v23_v15  ;;  %v30_v50 = vadd.s32 1, %v27_v14 }
   0xe   :  { %v32_v18 = vadd.s32 1, %v29_v16  ;;  %v31_v19 = vadd.s32 1, %v28_v17  ;;  %v33_v53 = vshrl.u32 %v30_v50, 16 }
  0x10   :  { %v35_v20 = vshrl.u32 %v32_v18, 16  ;;  %v34_v21 = vshrl.u32 %v31_v19, 16  ;;  %v36_v54 = vxor.u32 %v33_v53, %v30_v50 }
  0x12   :  { %v38_v22 = vxor.u32 %v35_v20, %v32_v18  ;;  %v37_v23 = vxor.u32 %v34_v21, %v31_v19  ;;  %v39_v55 = vmul.u32 2146121005, %v36_v54 }
  0x14   :  { %v41_v24 = vmul.u32 2146121005, %v38_v22  ;;  %v40_v25 = vmul.u32 2146121005, %v37_v23  ;;  %v42_v56 = vshrl.u32 %v39_v55, 15 }
  0x16   :  { %v44_v26 = vshrl.u32 %v41_v24, 15  ;;  %v43_v27 = vshrl.u32 %v40_v25, 15  ;;  %v45_v57 = vxor.u32 %v42_v56, %v39_v55 }
  0x18   :  { %v47_v28 = vxor.u32 %v44_v26, %v41_v24  ;;  %v46_v29 = vxor.u32 %v43_v27, %v40_v25  ;;  %v48_v58 = vmul.u32 2221713035, %v45_v57 }
  0x1a   :  { %v50_v30 = vmul.u32 2221713035, %v47_v28  ;;  %v49_v31 = vmul.u32 2221713035, %v46_v29  ;;  %v51_v59 = vshrl.u32 %v48_v58, 16 }
  0x1c   :  { %v53_v32 = vshrl.u32 %v50_v30, 16  ;;  %v52_v33 = vshrl.u32 %v49_v31, 16  ;;  %v54_v60 = vxor.u32 %v51_v59, %v48_v58 }
  0x1e   :  { %v56_v34 = vxor.u32 %v53_v32, %v50_v30  ;;  %v55_v35 = vxor.u32 %v52_v33, %v49_v31  ;;  %v57_v61 = vshrl.u32 %v54_v60, 31 }
  0x20   :  { %v59_v36 = vshrl.u32 %v56_v34, 31  ;;  %v58_v37 = vshrl.u32 %v55_v35, 31  ;;  %v137_v62 = vcvt.s32.f32 %v57_v61 }
  0x22   :  { %v75_v38 = vsel %vm72_vm2, %v59_v36, 0  ;;  %v74_v39 = vsel %vm69_vm1, %v58_v37, 0  ;;  %140 = vst [vmem:[%s186_s1] sm:$0xff] %v137_v62 }
  0x23   :  { %v105_v40 = vshra.s32 %v75_v38, 16  ;;  %v91_v41 = vshra.s32 %v74_v39, 16  ;;  %v104_v44 = vand.u32 65535, %v75_v38  ;;  %v90_v46 = vand.u32 65535, %v74_v39 }
  0x25   :  { %v107_v42 = vcvt.s32.f32 %v105_v40  ;;  %v93_v43 = vcvt.s32.f32 %v91_v41  ;;  %v106_v45 = vcvt.s32.f32 %v104_v44  ;;  %v92_v49 = vcvt.s32.f32 %v90_v46 }
  0x27   :  { %108 = vmax.xlane.f32.xlu0 %v107_v42 }
  0x2b   :  { %94 = vmax.xlane.f32.xlu0 %v93_v43 }
  0xb4   :  { %v109_v47 = vpop.xlane.xlu0 %108 }
  0xb5   :  { %vm110_vm3 = vcmp.eq.f32.partialorder %v107_v42, %v109_v47  ;;  %v115_v63 = vcvt.f32.s32 %v109_v47 }
  0xb6   :  { %v111_v48 = vsel %vm110_vm3, %v106_v45, -inf }
  0xb7   :  { %112 = vmax.xlane.f32.xlu1 %v111_v48  ;;  %v116_v1 = vshll.u32 %v115_v63, 16 }
  0xb8   :  { %v95_v51 = vpop.xlane.xlu0 %94 }
  0xb9   :  { %vm96_vm4 = vcmp.eq.f32.partialorder %v93_v43, %v95_v51  ;;  %v101_v2 = vcvt.f32.s32 %v95_v51 }
  0xba   :  { %v97_v52 = vsel %vm96_vm4, %v92_v49, -inf }
  0xbb   :  { %98 = vmax.xlane.f32.xlu1 %v97_v52  ;;  %v102_v8 = vshll.u32 %v101_v2, 16 }
 0x144   :  { %v113_v0 = vpop.xlane.xlu1 %112 }
 0x145   :  { %v114_v5 = vcvt.f32.s32 %v113_v0 }
 0x147   :  { %v117_v6 = vadd.s32 %v116_v1, %v114_v5 }
 0x148   :  { %v99_v7 = vpop.xlane.xlu1 %98 }
 0x149   :  { %vm120_vm6 = vcmp.eq.s32.totalorder %v117_v6, 0  ;;  %v100_v9 = vcvt.f32.s32 %v99_v7 }
 0x14a   :  { %vm129_vm7 = vmand %vm65_vm0, %vm120_vm6 }
 0x14b   :  { %vm133_vm8 = vmand %vm129_vm7, %vm130_vm5  ;;  %v103_v10 = vadd.s32 %v102_v8, %v100_v9 }
 0x14c   :  { %v136_v11 = vsel %vm133_vm8, 1, %v59_v36 }
 0x14d   :  { %v139_v12 = vcvt.s32.f32 %v136_v11  ;;  %vm119_vm9 = vcmp.eq.s32.totalorder %v103_v10, 0 }
 0x14e   :  { %vm132_vm10 = vmand %vm119_vm9, %vm130_vm5 }
 0x14f   :  { %142 = vst [vmem:[%s186_s1 + $0x10] sm:$0xff] %v139_v12  ;;  %v135_v13 = vsel %vm132_vm10, 1, %v58_v37 }
 0x150   :  { %v138_v14 = vcvt.s32.f32 %v135_v13 }
 0x152   :  { %141 = vst [vmem:[%s186_s1 + $0x8] sm:$0xff] %v138_v14 }

</bundles_post_ra>
